<compile_context>
chip_gen: v6e
topology: v6e:2x2x1
jax: 0.10.0
libtpu: 0.0.40
codegen_flags: <defaults>
</compile_context>

<pallas_src>
import functools

import jax
import jax.numpy as jnp
import numpy as np
from jax.experimental import pallas as pl
from jax.experimental.pallas import tpu as pltpu


def brm_inner_block_kernel(x_ref, w_ref, b_ref, m_ref, a_ref, o_ref, *, W):
    # x_ref : (R, HW)       one block of Bblk samples; row index = b*C + ci
    # w_ref : (3, R, 9*R)   per-layer block-diagonal im2col weights (f32)
    # b_ref : (3, R, 1)     per-row conv biases (f32)
    # m_ref : (9*R, HW)     zero-padding masks; row t*R + r = mask of tap t (f32 0/1)
    # a_ref : (3, 1)  SMEM  PReLU alphas (one scalar per layer)
    # o_ref : (R, HW)
    R, HW = x_ref.shape
    f32 = jnp.float32

    act = x_ref[...].astype(f32)

    for layer in range(3):
        # Build the im2col operand: tap t of activation row r lands at row
        # t*R + r.  Each tap is a static cyclic lane rotation; wrapped /
        # out-of-image lanes are zeroed by the precomputed mask (== padding=1).
        cols = []
        for dy in (-1, 0, 1):
            for dx in (-1, 0, 1):
                if dy == 0 and dx == 0:
                    cols.append(act)
                else:
                    shift = (-(dy * W + dx)) % HW   # tap[p] = act[p + dy*W + dx]
                    cols.append(pltpu.roll(act, shift=shift, axis=1))
        im2col = jnp.concatenate(cols, axis=0) * m_ref[...]        # (9R, HW)

        # Whole 3x3 conv for all Bblk samples in the block: one MXU matmul.
        acc = jnp.dot(w_ref[layer], im2col, preferred_element_type=f32)
        acc = acc + b_ref[layer]                                   # (R,1) bcast

        alpha = a_ref[layer, 0]
        act = jnp.where(acc >= 0, acc, alpha * acc)                # PReLU (f32)

    o_ref[...] = act.astype(o_ref.dtype)


def _pick_block_batch(N, C):
    """Samples per grid step: smallest divisor of N that fills the 8 sublanes
    (keeps the block-diagonal weight expansion small and leaves >=2 grid steps
    for v7x megacore once N grows)."""
    for b in range(1, N + 1):
        if N % b == 0 and (b * C) % 8 == 0 and b * C <= 64:
            return b
    return N      # fall back: block == full array is always a legal BlockSpec


@jax.jit
def brm_inner_block(x_nchw, weights_oihw, biases, alphas):
    """x_nchw: (N, C, H, W); weights_oihw: (3, C, C, 3, 3) PyTorch OIHW per
    layer; biases: (3, C); alphas: (3,).  Returns (N, C, H, W)."""
    N, C, H, W = x_nchw.shape
    HW = H * W
    Bblk = _pick_block_batch(N, C)
    R = Bblk * C
    grid = (N // Bblk,)
    f32 = jnp.float32

    # Free contiguous reshape -- activations stay NCHW, no transposes.
    x = x_nchw.reshape(N * C, HW)

    # (L,Cout,Cin,kh,kw) -> (L,Cout,kh,kw,Cin) -> (L,Cout,9*Cin); column index
    # (ky*3+kx)*Cin + ci matches the kernel's tap enumeration order.
    w2d = jnp.transpose(weights_oihw, (0, 1, 3, 4, 2)).reshape(3, C, 9 * C)
    w2d = w2d.astype(f32)
    # Block-diagonal expansion over the Bblk samples sharing a grid step:
    #   w_big[l, b*C+co, t*R + b2*C + ci] = w2d[l, co, t*C+ci] * (b == b2)
    eye = jnp.eye(Bblk, dtype=f32)
    w_big = (eye[None, :, None, None, :, None] *
             w2d.reshape(3, 1, C, 9, 1, C)).reshape(3, R, 9 * R)

    b_big = jnp.broadcast_to(biases.astype(f32)[:, None, :],
                             (3, Bblk, C)).reshape(3, R, 1)
    a = alphas.reshape(3, 1).astype(f32)

    # Zero-padding masks for the 9 taps, pre-expanded to the im2col rows.
    pos = jnp.arange(HW, dtype=jnp.int32)
    hpos, wpos = pos // W, pos % W
    mask_rows = []
    for dy in (-1, 0, 1):
        for dx in (-1, 0, 1):
            ok = ((hpos + dy >= 0) & (hpos + dy < H) &
                  (wpos + dx >= 0) & (wpos + dx < W))
            mask_rows.append(ok.astype(f32))
    masks = jnp.stack(mask_rows, axis=0)                           # (9, HW)
    mask_big = jnp.broadcast_to(masks[:, None, :],
                                (9, R, HW)).reshape(9 * R, HW)

    kernel = functools.partial(brm_inner_block_kernel, W=W)

    out = pl.pallas_call(
        kernel,
        out_shape=jax.ShapeDtypeStruct((N * C, HW), x_nchw.dtype),
        grid=grid,
        in_specs=[
            pl.BlockSpec((R, HW), lambda n: (n, 0)),               # activations
            pl.BlockSpec((3, R, 9 * R), lambda n: (0, 0, 0)),      # weights
            pl.BlockSpec((3, R, 1), lambda n: (0, 0, 0)),          # biases
            pl.BlockSpec((9 * R, HW), lambda n: (0, 0)),           # tap masks
            pl.BlockSpec((3, 1), lambda n: (0, 0),
                         memory_space=pltpu.MemorySpace.SMEM),     # PReLU alphas
        ],
        out_specs=pl.BlockSpec((R, HW), lambda n: (n, 0)),
        compiler_params=pltpu.CompilerParams(
            dimension_semantics=("parallel",)),
    )(x, w_big, b_big, mask_big, a)

    return out.reshape(N, C, H, W)


def reference(x_nchw, weights_oihw, biases, alphas):
    """Pure-JAX reference identical to the PyTorch forward."""
    y = x_nchw
    for layer in range(3):
        y = jax.lax.conv_general_dilated(
            y, weights_oihw[layer], window_strides=(1, 1), padding="SAME",
            dimension_numbers=("NCHW", "OIHW", "NCHW"),
            precision=jax.lax.Precision.HIGHEST)
        y = y + biases[layer][None, :, None, None]
        y = jnp.where(y >= 0, y, alphas[layer] * y)
    return y


if __name__ == "__main__":
    feat = 4
    N, H, W = 2, 16, 16

    key = jax.random.PRNGKey(0)
    k1, k2, k3 = jax.random.split(key, 3)

    x = jax.random.normal(k1, (N, feat, H, W), jnp.float32)
    # deterministic synthetic parameters (shapes follow the module __init__)
    weights = 0.1 * jax.random.normal(k2, (3, feat, feat, 3, 3), jnp.float32)
    biases = 0.1 * jax.random.normal(k3, (3, feat), jnp.float32)
    alphas = jnp.full((3,), 0.25, jnp.float32)   # nn.PReLU() default init

    out = brm_inner_block(x, weights, biases, alphas)
    out = jax.block_until_ready(out)

    ref = reference(x, weights, biases, alphas)
    # MXU matmul rounding can differ slightly from the HIGHEST-precision XLA
    # conv reference; tolerance loosened per the review's correctness note
    # (structural bugs would show up as O(0.1..1) errors, far above this).
    np.testing.assert_allclose(np.asarray(out), np.asarray(ref),
                               rtol=2e-2, atol=2e-2)

    print("KERNEL_OK")
</pallas_src>

<mosaic_0001>
module attributes {stable_mosaic.version = 11 : i64} {
  func.func @brm_inner_block_kernel(%arg0: i32, %arg1: memref<8x256xf32, #tpu.memory_space<vmem>>, %arg2: memref<3x8x72xf32, #tpu.memory_space<vmem>>, %arg3: memref<3x8x1xf32, #tpu.memory_space<vmem>>, %arg4: memref<72x256xf32, #tpu.memory_space<vmem>>, %arg5: memref<3x1xf32, #tpu.memory_space<smem>>, %arg6: memref<8x256xf32, #tpu.memory_space<vmem>>) attributes {dimension_semantics = [#tpu.dimension_semantics<parallel>], iteration_bounds = array<i64: 1>, scalar_prefetch = 0 : i64, scratch_operands = 0 : i64, tpu.core_type = #tpu.core_type<tc>, window_params = [{transform_indices = @transform_0, window_bounds = array<i64: 8, 256>}, {pipeline_mode = #tpu.pipeline_mode<synchronous>, transform_indices = @transform_1, window_bounds = array<i64: 3, 8, 72>}, {pipeline_mode = #tpu.pipeline_mode<synchronous>, transform_indices = @transform_2, window_bounds = array<i64: 3, 8, 1>}, {pipeline_mode = #tpu.pipeline_mode<synchronous>, transform_indices = @transform_3, window_bounds = array<i64: 72, 256>}, {transform_indices = @transform_4, window_bounds = array<i64: 3, 1>}, {transform_indices = @transform_5, window_bounds = array<i64: 8, 256>}]} {
    %c0 = arith.constant 0 : index
    %c0_0 = arith.constant 0 : index
    %0 = vector.load %arg1[%c0, %c0_0] : memref<8x256xf32, #tpu.memory_space<vmem>>, vector<8x256xf32>
    %c17_i32 = arith.constant 17 : i32
    %1 = tpu.dynamic_rotate %0 by %c17_i32 dim 1 : vector<8x256xf32>, i32 -> vector<8x256xf32>
    %c16_i32 = arith.constant 16 : i32
    %2 = tpu.dynamic_rotate %0 by %c16_i32 dim 1 : vector<8x256xf32>, i32 -> vector<8x256xf32>
    %c15_i32 = arith.constant 15 : i32
    %3 = tpu.dynamic_rotate %0 by %c15_i32 dim 1 : vector<8x256xf32>, i32 -> vector<8x256xf32>
    %c1_i32 = arith.constant 1 : i32
    %4 = tpu.dynamic_rotate %0 by %c1_i32 dim 1 : vector<8x256xf32>, i32 -> vector<8x256xf32>
    %c255_i32 = arith.constant 255 : i32
    %5 = tpu.dynamic_rotate %0 by %c255_i32 dim 1 : vector<8x256xf32>, i32 -> vector<8x256xf32>
    %c241_i32 = arith.constant 241 : i32
    %6 = tpu.dynamic_rotate %0 by %c241_i32 dim 1 : vector<8x256xf32>, i32 -> vector<8x256xf32>
    %c240_i32 = arith.constant 240 : i32
    %7 = tpu.dynamic_rotate %0 by %c240_i32 dim 1 : vector<8x256xf32>, i32 -> vector<8x256xf32>
    %c239_i32 = arith.constant 239 : i32
    %8 = tpu.dynamic_rotate %0 by %c239_i32 dim 1 : vector<8x256xf32>, i32 -> vector<8x256xf32>
    %9 = tpu.concatenate %1, %2, %3, %4, %0, %5, %6, %7, %8 in 0 : vector<8x256xf32>, vector<8x256xf32>, vector<8x256xf32>, vector<8x256xf32>, vector<8x256xf32>, vector<8x256xf32>, vector<8x256xf32>, vector<8x256xf32>, vector<8x256xf32> -> vector<72x256xf32>
    %c0_1 = arith.constant 0 : index
    %c0_2 = arith.constant 0 : index
    %10 = vector.load %arg4[%c0_1, %c0_2] : memref<72x256xf32, #tpu.memory_space<vmem>>, vector<72x256xf32>
    %11 = arith.mulf %9, %10 : vector<72x256xf32>
    %c0_3 = arith.constant 0 : index
    %c0_4 = arith.constant 0 : index
    %c0_5 = arith.constant 0 : index
    %12 = vector.load %arg2[%c0_3, %c0_4, %c0_5] : memref<3x8x72xf32, #tpu.memory_space<vmem>>, vector<1x8x72xf32>
    %13 = vector.shape_cast %12 : vector<1x8x72xf32> to vector<8x72xf32>
    %cst = arith.constant dense<0.000000e+00> : vector<8x256xf32>
    %14 = tpu.matmul %13, %11, %cst {dimension_numbers = #tpu.dot_dimension_numbers<[1], [0], [0], [1], [0, 0, 1, 1], [], []>} : vector<8x72xf32>, vector<72x256xf32>, vector<8x256xf32> -> vector<8x256xf32>
    %c0_6 = arith.constant 0 : index
    %c0_7 = arith.constant 0 : index
    %c0_8 = arith.constant 0 : index
    %15 = vector.load %arg3[%c0_6, %c0_7, %c0_8] : memref<3x8x1xf32, #tpu.memory_space<vmem>>, vector<1x8x1xf32>
    %16 = vector.shape_cast %15 : vector<1x8x1xf32> to vector<8x1xf32>
    %17 = vector.broadcast %16 : vector<8x1xf32> to vector<8x256xf32>
    %18 = arith.addf %14, %17 : vector<8x256xf32>
    %c0_9 = arith.constant 0 : index
    %c0_10 = arith.constant 0 : index
    %19 = memref.load %arg5[%c0_9, %c0_10] : memref<3x1xf32, #tpu.memory_space<smem>>
    %cst_11 = arith.constant 0.000000e+00 : f32
    %20 = vector.broadcast %cst_11 : f32 to vector<8x256xf32>
    %21 = arith.cmpf oge, %18, %20 : vector<8x256xf32>
    %22 = vector.broadcast %19 : f32 to vector<8x256xf32>
    %23 = arith.mulf %22, %18 : vector<8x256xf32>
    %24 = arith.select %21, %18, %23 : vector<8x256xi1>, vector<8x256xf32>
    %c17_i32_12 = arith.constant 17 : i32
    %25 = tpu.dynamic_rotate %24 by %c17_i32_12 dim 1 : vector<8x256xf32>, i32 -> vector<8x256xf32>
    %c16_i32_13 = arith.constant 16 : i32
    %26 = tpu.dynamic_rotate %24 by %c16_i32_13 dim 1 : vector<8x256xf32>, i32 -> vector<8x256xf32>
    %c15_i32_14 = arith.constant 15 : i32
    %27 = tpu.dynamic_rotate %24 by %c15_i32_14 dim 1 : vector<8x256xf32>, i32 -> vector<8x256xf32>
    %c1_i32_15 = arith.constant 1 : i32
    %28 = tpu.dynamic_rotate %24 by %c1_i32_15 dim 1 : vector<8x256xf32>, i32 -> vector<8x256xf32>
    %c255_i32_16 = arith.constant 255 : i32
    %29 = tpu.dynamic_rotate %24 by %c255_i32_16 dim 1 : vector<8x256xf32>, i32 -> vector<8x256xf32>
    %c241_i32_17 = arith.constant 241 : i32
    %30 = tpu.dynamic_rotate %24 by %c241_i32_17 dim 1 : vector<8x256xf32>, i32 -> vector<8x256xf32>
    %c240_i32_18 = arith.constant 240 : i32
    %31 = tpu.dynamic_rotate %24 by %c240_i32_18 dim 1 : vector<8x256xf32>, i32 -> vector<8x256xf32>
    %c239_i32_19 = arith.constant 239 : i32
    %32 = tpu.dynamic_rotate %24 by %c239_i32_19 dim 1 : vector<8x256xf32>, i32 -> vector<8x256xf32>
    %33 = tpu.concatenate %25, %26, %27, %28, %24, %29, %30, %31, %32 in 0 : vector<8x256xf32>, vector<8x256xf32>, vector<8x256xf32>, vector<8x256xf32>, vector<8x256xf32>, vector<8x256xf32>, vector<8x256xf32>, vector<8x256xf32>, vector<8x256xf32> -> vector<72x256xf32>
    %c0_20 = arith.constant 0 : index
    %c0_21 = arith.constant 0 : index
    %34 = vector.load %arg4[%c0_20, %c0_21] : memref<72x256xf32, #tpu.memory_space<vmem>>, vector<72x256xf32>
    %35 = arith.mulf %33, %34 : vector<72x256xf32>
    %c1 = arith.constant 1 : index
    %c0_22 = arith.constant 0 : index
    %c0_23 = arith.constant 0 : index
    %36 = vector.load %arg2[%c1, %c0_22, %c0_23] : memref<3x8x72xf32, #tpu.memory_space<vmem>>, vector<1x8x72xf32>
    %37 = vector.shape_cast %36 : vector<1x8x72xf32> to vector<8x72xf32>
    %cst_24 = arith.constant dense<0.000000e+00> : vector<8x256xf32>
    %38 = tpu.matmul %37, %35, %cst_24 {dimension_numbers = #tpu.dot_dimension_numbers<[1], [0], [0], [1], [0, 0, 1, 1], [], []>} : vector<8x72xf32>, vector<72x256xf32>, vector<8x256xf32> -> vector<8x256xf32>
    %c1_25 = arith.constant 1 : index
    %c0_26 = arith.constant 0 : index
    %c0_27 = arith.constant 0 : index
    %39 = vector.load %arg3[%c1_25, %c0_26, %c0_27] : memref<3x8x1xf32, #tpu.memory_space<vmem>>, vector<1x8x1xf32>
    %40 = vector.shape_cast %39 : vector<1x8x1xf32> to vector<8x1xf32>
    %41 = vector.broadcast %40 : vector<8x1xf32> to vector<8x256xf32>
    %42 = arith.addf %38, %41 : vector<8x256xf32>
    %c1_28 = arith.constant 1 : index
    %c0_29 = arith.constant 0 : index
    %43 = memref.load %arg5[%c1_28, %c0_29] : memref<3x1xf32, #tpu.memory_space<smem>>
    %cst_30 = arith.constant 0.000000e+00 : f32
    %44 = vector.broadcast %cst_30 : f32 to vector<8x256xf32>
    %45 = arith.cmpf oge, %42, %44 : vector<8x256xf32>
    %46 = vector.broadcast %43 : f32 to vector<8x256xf32>
    %47 = arith.mulf %46, %42 : vector<8x256xf32>
    %48 = arith.select %45, %42, %47 : vector<8x256xi1>, vector<8x256xf32>
    %c17_i32_31 = arith.constant 17 : i32
    %49 = tpu.dynamic_rotate %48 by %c17_i32_31 dim 1 : vector<8x256xf32>, i32 -> vector<8x256xf32>
    %c16_i32_32 = arith.constant 16 : i32
    %50 = tpu.dynamic_rotate %48 by %c16_i32_32 dim 1 : vector<8x256xf32>, i32 -> vector<8x256xf32>
    %c15_i32_33 = arith.constant 15 : i32
    %51 = tpu.dynamic_rotate %48 by %c15_i32_33 dim 1 : vector<8x256xf32>, i32 -> vector<8x256xf32>
    %c1_i32_34 = arith.constant 1 : i32
    %52 = tpu.dynamic_rotate %48 by %c1_i32_34 dim 1 : vector<8x256xf32>, i32 -> vector<8x256xf32>
    %c255_i32_35 = arith.constant 255 : i32
    %53 = tpu.dynamic_rotate %48 by %c255_i32_35 dim 1 : vector<8x256xf32>, i32 -> vector<8x256xf32>
    %c241_i32_36 = arith.constant 241 : i32
    %54 = tpu.dynamic_rotate %48 by %c241_i32_36 dim 1 : vector<8x256xf32>, i32 -> vector<8x256xf32>
    %c240_i32_37 = arith.constant 240 : i32
    %55 = tpu.dynamic_rotate %48 by %c240_i32_37 dim 1 : vector<8x256xf32>, i32 -> vector<8x256xf32>
    %c239_i32_38 = arith.constant 239 : i32
    %56 = tpu.dynamic_rotate %48 by %c239_i32_38 dim 1 : vector<8x256xf32>, i32 -> vector<8x256xf32>
    %57 = tpu.concatenate %49, %50, %51, %52, %48, %53, %54, %55, %56 in 0 : vector<8x256xf32>, vector<8x256xf32>, vector<8x256xf32>, vector<8x256xf32>, vector<8x256xf32>, vector<8x256xf32>, vector<8x256xf32>, vector<8x256xf32>, vector<8x256xf32> -> vector<72x256xf32>
    %c0_39 = arith.constant 0 : index
    %c0_40 = arith.constant 0 : index
    %58 = vector.load %arg4[%c0_39, %c0_40] : memref<72x256xf32, #tpu.memory_space<vmem>>, vector<72x256xf32>
    %59 = arith.mulf %57, %58 : vector<72x256xf32>
    %c2 = arith.constant 2 : index
    %c0_41 = arith.constant 0 : index
    %c0_42 = arith.constant 0 : index
    %60 = vector.load %arg2[%c2, %c0_41, %c0_42] : memref<3x8x72xf32, #tpu.memory_space<vmem>>, vector<1x8x72xf32>
    %61 = vector.shape_cast %60 : vector<1x8x72xf32> to vector<8x72xf32>
    %cst_43 = arith.constant dense<0.000000e+00> : vector<8x256xf32>
    %62 = tpu.matmul %61, %59, %cst_43 {dimension_numbers = #tpu.dot_dimension_numbers<[1], [0], [0], [1], [0, 0, 1, 1], [], []>} : vector<8x72xf32>, vector<72x256xf32>, vector<8x256xf32> -> vector<8x256xf32>
    %c2_44 = arith.constant 2 : index
    %c0_45 = arith.constant 0 : index
    %c0_46 = arith.constant 0 : index
    %63 = vector.load %arg3[%c2_44, %c0_45, %c0_46] : memref<3x8x1xf32, #tpu.memory_space<vmem>>, vector<1x8x1xf32>
    %64 = vector.shape_cast %63 : vector<1x8x1xf32> to vector<8x1xf32>
    %65 = vector.broadcast %64 : vector<8x1xf32> to vector<8x256xf32>
    %66 = arith.addf %62, %65 : vector<8x256xf32>
    %c2_47 = arith.constant 2 : index
    %c0_48 = arith.constant 0 : index
    %67 = memref.load %arg5[%c2_47, %c0_48] : memref<3x1xf32, #tpu.memory_space<smem>>
    %cst_49 = arith.constant 0.000000e+00 : f32
    %68 = vector.broadcast %cst_49 : f32 to vector<8x256xf32>
    %69 = arith.cmpf oge, %66, %68 : vector<8x256xf32>
    %70 = vector.broadcast %67 : f32 to vector<8x256xf32>
    %71 = arith.mulf %70, %66 : vector<8x256xf32>
    %72 = arith.select %69, %66, %71 : vector<8x256xi1>, vector<8x256xf32>
    %c0_50 = arith.constant 0 : index
    %c0_51 = arith.constant 0 : index
    %73 = vector.load %arg6[%c0_50, %c0_51] : memref<8x256xf32, #tpu.memory_space<vmem>>, vector<8x256xf32>
    tpu.vector_store %arg6[%c0_50, %c0_51], %72 {strides = array<i32>} : memref<8x256xf32, #tpu.memory_space<vmem>>, vector<8x256xf32>,
    return
  }
  func.func @transform_0(%arg0: i32) -> (i32, i32) {
    %c0_i32 = arith.constant 0 : i32
    %c0_i32_0 = arith.constant 0 : i32
    return %arg0, %c0_i32 : i32, i32
  }
  func.func @transform_1(%arg0: i32) -> (i32, i32, i32) {
    %c0_i32 = arith.constant 0 : i32
    %c0_i32_0 = arith.constant 0 : i32
    %c0_i32_1 = arith.constant 0 : i32
    %c0_i32_2 = arith.constant 0 : i32
    return %c0_i32, %c0_i32_0, %c0_i32_1 : i32, i32, i32
  }
  func.func @transform_2(%arg0: i32) -> (i32, i32, i32) {
    %c0_i32 = arith.constant 0 : i32
    %c0_i32_0 = arith.constant 0 : i32
    %c0_i32_1 = arith.constant 0 : i32
    %c0_i32_2 = arith.constant 0 : i32
    return %c0_i32, %c0_i32_0, %c0_i32_1 : i32, i32, i32
  }
  func.func @transform_3(%arg0: i32) -> (i32, i32) {
    %c0_i32 = arith.constant 0 : i32
    %c0_i32_0 = arith.constant 0 : i32
    %c0_i32_1 = arith.constant 0 : i32
    return %c0_i32, %c0_i32_0 : i32, i32
  }
  func.func @transform_4(%arg0: i32) -> (i32, i32) {
    %c0_i32 = arith.constant 0 : i32
    %c0_i32_0 = arith.constant 0 : i32
    %c0_i32_1 = arith.constant 0 : i32
    return %c0_i32, %c0_i32_0 : i32, i32
  }
  func.func @transform_5(%arg0: i32) -> (i32, i32) {
    %c0_i32 = arith.constant 0 : i32
    %c0_i32_0 = arith.constant 0 : i32
    return %arg0, %c0_i32 : i32, i32
  }
}

</mosaic_0001>

<bundles_post_ra>
// kernel: brm_inner_block.1
= control target key start
LH: loop header
LB: loop body
LE: loop exit
PB: predicated region body
PF: predicated region fallthrough
CT: control target
= control target key end

     0   :  { %10 = vsyncpa [#allocation3], 0  ;;  %s976_s0 = inlined_call_operand.vmem [shape: f32[8,256], index: 0, kind: input, shape index: {}]   ;;  %s977_s1 = inlined_call_operand.vmem [shape: f32[3,8,72], index: 1, kind: input, shape index: {}]   ;;  %s978_s2 = inlined_call_operand.vmem [shape: f32[3,8,1], index: 2, kind: input, shape index: {}]   ;;  %s979_s3 = inlined_call_operand.vmem [shape: f32[72,256], index: 3, kind: input, shape index: {}]   ;;  %s980_s4 = inlined_call_operand.vmem [shape: f32[3,1], index: 4, kind: input, shape index: {}]   ;;  %s981_s5 = inlined_call_operand.vmem [shape: f32[8,256], index: 5, kind: output, shape index: {}]  }
   0x1   :  { %s25_s20 = sshll.u32 %s980_s4, 4  ;;  %s26_s20 = int_to_ptr.vmem [resolvable:$true] %s25_s20 }
   0x2   :  { %s562_s21 = scalar_lea.vmem %s26_s20, 64  ;;  %p567_p1 = scmp.lt.s32.totalorder %s26_s20, %s26_s20 }
   0x3   :  { %p563_p0 = scmp.ne.s32.totalorder %s26_s20, %s562_s21  ;;  %p568_p2 = scmp.lt.s32.totalorder %s562_s21, %s562_s21 }
   0x5   :  { %p569_p3 = por %p568_p2, %p567_p1 }
   0x7   :  { %p570_p4 = pnand %p569_p3, %p563_p0 }
   0x9   :  { %573 = shalt.err (!%p570_p4)
}
   0xa   :  { %s576_s22 = smov [#allocation2]  }
   0xb   :  { %28 = dma.vmem_to_smem %s26_s20, 64, %s576_s22, [#allocation3]  }
   0xc   :  { %574 = dma.done.wait [#allocation3], 64  }
   0xd   :  { %575 = vsyncadd [#allocation3], 4294967232 }
   0xe   :  { %32 = sfence }
   0xf   :  { %v623_v0 = vld [vmem:[%s976_s0] sm:$0xff]  ;;  %s577_s25 = smov 112   ;;  %s578_s4 = smov 111   ;;  %v632_v1 = vld [vmem:[%s976_s0 + $0x8] sm:$0xff]  ;;  %v582_v2 = vmov 0.0   ;;  %v584_v3 = vmov 0   ;;  %v39_v5 = vlaneseq }
  0x10   :  { %79 = vrot.lane.b32.xlu1 %v623_v0, %s577_s25  ;;  %86 = vrot.lane.b32.xlu0 %v623_v0, %s578_s4  ;;  %s579_s28 = smov 113   ;;  %s580_s29 = smov 127   ;;  %v130_v4 = vld [vmem:[%s978_s2] sm:$0xff]  ;;  %v674_v9 = vld [vmem:[%s979_s3 + $0x88] sm:$0xff]  ;;  %vm136_vm8 = vcmask 588800  }
  0x11   :  { %s581_s0 = smov 1   ;;  %204 = vmatprep.mubr.f32.mxu0 %v582_v2  ;;  %361 = vmatprep.mubr.f32.mxu1 %v582_v2  ;;  %s583_s30 = smov 15   ;;  %v667_v6 = vand.u32 127, %v39_v5  ;;  %v679_v10 = vld [vmem:[%s979_s3 + $0x80] sm:$0xff]  ;;  %v684_v13 = vld [vmem:[%s979_s3 + $0x78] sm:$0xff]  ;;  %v695_v17 = vld [vmem:[%s979_s3 + $0x70] sm:$0xff] }
  0x12   :  { %560 = vset.pattern.permute.xlu0 %v584_v3  ;;  %561 = vset.pattern.permute.xlu1 %v584_v3  ;;  %s585_s6 = smov 16   ;;  %s586_s7 = smov 17   ;;  %v705_v21 = vld [vmem:[%s979_s3 + $0x60] sm:$0xff]  ;;  %v710_v22 = vld [vmem:[%s979_s3 + $0x68] sm:$0xff]  ;;  %v724_v31 = vld [vmem:[%s979_s3 + $0x50] sm:$0xff] }
  0x13   :  { %vm83_vm0 = vcmp.lt.s32.totalorder %v667_v6, 112  ;;  %vm90_vm1 = vcmp.lt.s32.totalorder %v667_v6, 111  ;;  %vm76_vm2 = vcmp.lt.s32.totalorder %v667_v6, 113  ;;  %vm69_vm3 = vcmp.lt.s32.totalorder %v667_v6, 127  ;;  %v729_v32 = vld [vmem:[%s979_s3 + $0x58] sm:$0xff]  ;;  %v734_v33 = vld [vmem:[%s979_s3 + $0x48] sm:$0xff] }
  0x14   :  { %81 = vrot.lane.b32.xlu1 %v632_v1, %s577_s25  ;;  %88 = vrot.lane.b32.xlu0 %v632_v1, %s578_s4  ;;  %v739_v36 = vld [vmem:[%s979_s3 + $0x40] sm:$0xff]  ;;  %vm62_vm4 = vcmp.lt.s32.totalorder %v667_v6, 1  ;;  %v120_v41 = vmul.f32 %v734_v33, %v632_v1  ;;  %v753_v42 = vld [vmem:[%s979_s3 + $0x30] sm:$0xff]  ;;  %vm55_vm5 = vcmp.lt.s32.totalorder %v667_v6, 15  ;;  %vm48_vm6 = vcmp.lt.s32.totalorder %v667_v6, 16  ;;  %s544_s14 = sld [smem:[#allocation2 + $0x80]] }
  0x15   :  { %v758_v43 = vld [vmem:[%s979_s3 + $0x38] sm:$0xff]  ;;  %v119_v44 = vmul.f32 %v739_v36, %v623_v0  ;;  %v772_v51 = vld [vmem:[%s979_s3 + $0x20] sm:$0xff]  ;;  %v777_v52 = vld [vmem:[%s979_s3 + $0x28] sm:$0xff]  ;;  %vm41_vm7 = vcmp.lt.s32.totalorder %v667_v6, 17 }
  0x16   :  { %v789_v59 = vld [vmem:[%s979_s3 + $0x10] sm:$0xff]  ;;  %v794_v60 = vld [vmem:[%s979_s3 + $0x18] sm:$0xff]  ;;  %v811_v5 = vld [vmem:[%s979_s3 + $0x8] sm:$0xff] }
  0x18   :  { %74 = vrot.lane.b32.xlu1 %v632_v1, %s579_s28  ;;  %72 = vrot.lane.b32.xlu0 %v623_v0, %s579_s28 }
  0x1c   :  { %67 = vrot.lane.b32.xlu1 %v632_v1, %s580_s29  ;;  %65 = vrot.lane.b32.xlu0 %v623_v0, %s580_s29 }
  0x20   :  { %60 = vrot.lane.b32.xlu1 %v632_v1, %s581_s0  ;;  %58 = vrot.lane.b32.xlu0 %v623_v0, %s581_s0 }
  0x24   :  { %53 = vrot.lane.b32.xlu1 %v632_v1, %s583_s30  ;;  %51 = vrot.lane.b32.xlu0 %v623_v0, %s583_s30 }
  0x28   :  { %46 = vrot.lane.b32.xlu1 %v632_v1, %s585_s6  ;;  %44 = vrot.lane.b32.xlu0 %v623_v0, %s585_s6 }
  0x2c   :  { %37 = vrot.lane.b32.xlu1 %v632_v1, %s586_s7  ;;  %35 = vrot.lane.b32.xlu0 %v623_v0, %s586_s7 }
  0x30   :  { %133 = vperm.xlu0 %560, %v130_v4   ;;  %v806_v4 = vld [vmem:[%s979_s3] sm:$0xff]  ;;  %s211_s3 = sld [smem:[#allocation2]] }
  0x82   :  { %v80_v7 = vpop.permute.xlu1 %79  ;;  %v87_v8 = vpop.permute.xlu0 %86 }
  0x86   :  { %v82_v11 = vpop.permute.xlu1 %81  ;;  %v89_v12 = vpop.permute.xlu0 %88 }
  0x87   :  { %v85_v14 = vsel %vm83_vm0, %v82_v11, %v80_v7  ;;  %v91_v15 = vsel %vm90_vm1, %v87_v8, %v89_v12  ;;  %v92_v16 = vsel %vm90_vm1, %v89_v12, %v87_v8  ;;  %v84_v18 = vsel %vm83_vm0, %v80_v7, %v82_v11 }
  0x88   :  { %v128_v19 = vmul.f32 %v674_v9, %v92_v16  ;;  %v127_v20 = vmul.f32 %v679_v10, %v91_v15  ;;  %v126_v23 = vmul.f32 %v684_v13, %v85_v14  ;;  %v125_v26 = vmul.f32 %v695_v17, %v84_v18  ;;  %v129_v16 = vld [vmem:[%s977_s1] sm:$0xff] }
  0x8a   :  { %v75_v24 = vpop.permute.xlu1 %74  ;;  %154 = vmatprep.subr.mxu0 %v128_v19  ;;  %v73_v25 = vpop.permute.xlu0 %72 }
  0x8b   :  { %v77_v27 = vsel %vm76_vm2, %v73_v25, %v75_v24  ;;  %v78_v28 = vsel %vm76_vm2, %v75_v24, %v73_v25  ;;  %155 = vmatpush1.msra.mxu0 %v127_v20  ;;  %v214_v20 = vstv %s211_s3 }
  0x8c   :  { %v123_v29 = vmul.f32 %v705_v21, %v77_v27  ;;  %v124_v30 = vmul.f32 %v710_v22, %v78_v28  ;;  %156 = vmatprep.subr.mxu0 %v126_v23 }
  0x8d   :  { %157 = vmatpush1.msra.mxu0 %v125_v26 }
  0x8e   :  { %v68_v34 = vpop.permute.xlu1 %67  ;;  %158 = vmatprep.subr.mxu0 %v124_v30  ;;  %v66_v35 = vpop.permute.xlu0 %65 }
  0x8f   :  { %v70_v37 = vsel %vm69_vm3, %v66_v35, %v68_v34  ;;  %v71_v38 = vsel %vm69_vm3, %v68_v34, %v66_v35  ;;  %159 = vmatpush1.msra.mxu0 %v123_v29 }
  0x90   :  { %v121_v39 = vmul.f32 %v724_v31, %v70_v37  ;;  %v122_v40 = vmul.f32 %v729_v32, %v71_v38 }
  0x92   :  { %v61_v45 = vpop.permute.xlu1 %60  ;;  %160 = vmatprep.subr.mxu0 %v122_v40  ;;  %v59_v46 = vpop.permute.xlu0 %58 }
  0x93   :  { %v63_v47 = vsel %vm62_vm4, %v59_v46, %v61_v45  ;;  %v64_v48 = vsel %vm62_vm4, %v61_v45, %v59_v46  ;;  %161 = vmatpush1.msra.mxu0 %v121_v39 }
  0x94   :  { %v117_v49 = vmul.f32 %v753_v42, %v64_v48  ;;  %v118_v50 = vmul.f32 %v758_v43, %v63_v47  ;;  %162 = vmatprep.subr.mxu0 %v120_v41 }
  0x95   :  { %163 = vmatpush1.msra.mxu0 %v119_v44 }
  0x96   :  { %v54_v53 = vpop.permute.xlu1 %53  ;;  %v52_v54 = vpop.permute.xlu0 %51  ;;  %164 = vmatprep.subr.mxu0 %v118_v50 }
  0x97   :  { %v56_v55 = vsel %vm55_vm5, %v52_v54, %v54_v53  ;;  %v57_v56 = vsel %vm55_vm5, %v54_v53, %v52_v54  ;;  %165 = vmatpush1.msra.mxu0 %v117_v49 }
  0x98   :  { %v115_v57 = vmul.f32 %v772_v51, %v57_v56  ;;  %v116_v58 = vmul.f32 %v777_v52, %v56_v55 }
  0x9a   :  { %v47_v61 = vpop.permute.xlu1 %46  ;;  %v45_v62 = vpop.permute.xlu0 %44  ;;  %166 = vmatprep.subr.mxu0 %v116_v58 }
  0x9b   :  { %v49_v63 = vsel %vm48_vm6, %v45_v62, %v47_v61  ;;  %v50_v0 = vsel %vm48_vm6, %v47_v61, %v45_v62  ;;  %167 = vmatpush1.msra.mxu0 %v115_v57 }
  0x9c   :  { %v113_v1 = vmul.f32 %v789_v59, %v50_v0  ;;  %v114_v3 = vmul.f32 %v794_v60, %v49_v63 }
  0x9e   :  { %v38_v7 = vpop.permute.xlu1 %37  ;;  %v36_v8 = vpop.permute.xlu0 %35  ;;  %168 = vmatprep.subr.mxu0 %v114_v3 }
  0x9f   :  { %v42_v11 = vsel %vm41_vm7, %v36_v8, %v38_v7  ;;  %v43_v12 = vsel %vm41_vm7, %v38_v7, %v36_v8  ;;  %169 = vmatpush1.msra.mxu0 %v113_v1 }
  0xa0   :  { %v111_v14 = vmul.f32 %v806_v4, %v43_v12  ;;  %v112_v15 = vmul.f32 %v811_v5, %v42_v11 }
  0xa2   :  { %170 = vmatprep.subr.mxu0 %v112_v15 }
  0xa3   :  { %171 = vmatpush1.msra.mxu0 %v111_v14 }
  0xa4   :  { %540 = vmatmul.mubr.msk.f32.vlgmr.msra.gmra.mxu0 %vm136_vm8, %v129_v16 }
  0xa5   :  { %518 = vmatprep.mubr.f32.mxu0 %v582_v2  ;;  %v542_v2 = vld [vmem:[%s978_s2 + $0x8] sm:$0xff] }
  0xab   :  { %v134_v18 = vpop.permute.xlu0 %133 }
 0x164   :  { %v206_v19 = vpop.f32.mrf.mxu0 }
 0x165   :  { %v207_v23 = vadd.f32 %v206_v19, %v134_v18 }
 0x166   :  { %v208_v24 = vpop.f32.mrf.mxu0 }
 0x167   :  { %vm212_vm9 = vcmp.ge.f32.partialorder %v207_v23, 0.0  ;;  %v215_v25 = vmul.f32 %v214_v20, %v207_v23  ;;  %v209_v26 = vadd.f32 %v208_v24, %v134_v18 }
 0x169   :  { %v217_v27 = vsel %vm212_vm9, %v207_v23, %v215_v25  ;;  %v216_v28 = vmul.f32 %v214_v20, %v209_v26  ;;  %vm213_vm10 = vcmp.ge.f32.partialorder %v209_v26, 0.0 }
 0x16a   :  { %255 = vrot.lane.b32.xlu0 %v217_v27, %s577_s25  ;;  %261 = vrot.lane.b32.xlu1 %v217_v27, %s578_s4  ;;  %v275_v12 = vmul.f32 %v217_v27, %v739_v36 }
 0x16b   :  { %v218_v29 = vsel %vm213_vm10, %v209_v26, %v216_v28 }
 0x16c   :  { %v276_v7 = vmul.f32 %v218_v29, %v734_v33 }
 0x16e   :  { %249 = vrot.lane.b32.xlu0 %v217_v27, %s579_s28  ;;  %263 = vrot.lane.b32.xlu1 %v218_v29, %s578_s4 }
 0x172   :  { %243 = vrot.lane.b32.xlu0 %v217_v27, %s580_s29  ;;  %257 = vrot.lane.b32.xlu1 %v218_v29, %s577_s25 }
 0x176   :  { %237 = vrot.lane.b32.xlu0 %v217_v27, %s581_s0  ;;  %251 = vrot.lane.b32.xlu1 %v218_v29, %s579_s28 }
 0x17a   :  { %231 = vrot.lane.b32.xlu0 %v217_v27, %s583_s30  ;;  %245 = vrot.lane.b32.xlu1 %v218_v29, %s580_s29 }
 0x17e   :  { %225 = vrot.lane.b32.xlu0 %v217_v27, %s585_s6  ;;  %239 = vrot.lane.b32.xlu1 %v218_v29, %s581_s0 }
 0x182   :  { %219 = vrot.lane.b32.xlu0 %v217_v27, %s586_s7  ;;  %233 = vrot.lane.b32.xlu1 %v218_v29, %s583_s30 }
 0x186   :  { %291 = vperm.xlu0 %560, %v542_v2   ;;  %227 = vrot.lane.b32.xlu1 %v218_v29, %s585_s6 }
 0x18a   :  { %221 = vrot.lane.b32.xlu1 %v218_v29, %s586_s7 }
 0x1dc   :  { %v256_v30 = vpop.permute.xlu0 %255  ;;  %v262_v34 = vpop.permute.xlu1 %261 }
 0x1e0   :  { %v250_v35 = vpop.permute.xlu0 %249  ;;  %v264_v37 = vpop.permute.xlu1 %263 }
 0x1e1   :  { %v265_v38 = vsel %vm90_vm1, %v262_v34, %v264_v37  ;;  %v266_v39 = vsel %vm90_vm1, %v264_v37, %v262_v34 }
 0x1e2   :  { %v284_v40 = vmul.f32 %v266_v39, %v674_v9  ;;  %v283_v41 = vmul.f32 %v265_v38, %v679_v10  ;;  %v541_v39 = vld [vmem:[%s977_s1 + $0x8] sm:$0xff] }
 0x1e4   :  { %v244_v44 = vpop.permute.xlu0 %243  ;;  %311 = vmatprep.subr.mxu1 %v284_v40  ;;  %v258_v45 = vpop.permute.xlu1 %257 }
 0x1e5   :  { %v259_v46 = vsel %vm83_vm0, %v256_v30, %v258_v45  ;;  %v260_v47 = vsel %vm83_vm0, %v258_v45, %v256_v30  ;;  %312 = vmatpush1.msra.mxu1 %v283_v41 }
 0x1e6   :  { %v281_v48 = vmul.f32 %v259_v46, %v695_v17  ;;  %v282_v49 = vmul.f32 %v260_v47, %v684_v13 }
 0x1e8   :  { %313 = vmatprep.subr.mxu1 %v282_v49  ;;  %v252_v50 = vpop.permute.xlu1 %251  ;;  %v238_v55 = vpop.permute.xlu0 %237 }
 0x1e9   :  { %v253_v53 = vsel %vm76_vm2, %v250_v35, %v252_v50  ;;  %v254_v54 = vsel %vm76_vm2, %v252_v50, %v250_v35  ;;  %314 = vmatpush1.msra.mxu1 %v281_v48 }
 0x1ea   :  { %v279_v56 = vmul.f32 %v253_v53, %v705_v21  ;;  %v280_v57 = vmul.f32 %v254_v54, %v710_v22  ;;  %v546_v54 = vld [vmem:[%s978_s2 + $0x10] sm:$0xff] }
 0x1ec   :  { %315 = vmatprep.subr.mxu1 %v280_v57  ;;  %v246_v58 = vpop.permute.xlu1 %245  ;;  %v232_v1 = vpop.permute.xlu0 %231 }
 0x1ed   :  { %v247_v61 = vsel %vm69_vm3, %v244_v44, %v246_v58  ;;  %v248_v62 = vsel %vm69_vm3, %v246_v58, %v244_v44  ;;  %316 = vmatpush1.msra.mxu1 %v279_v56  ;;  %v371_v44 = vstv %s544_s14 }
 0x1ee   :  { %v277_v63 = vmul.f32 %v247_v61, %v724_v31  ;;  %v278_v0 = vmul.f32 %v248_v62, %v729_v32 }
 0x1f0   :  { %317 = vmatprep.subr.mxu1 %v278_v0  ;;  %v240_v3 = vpop.permute.xlu1 %239  ;;  %v226_v20 = vpop.permute.xlu0 %225 }
 0x1f1   :  { %v241_v8 = vsel %vm62_vm4, %v238_v55, %v240_v3  ;;  %v242_v11 = vsel %vm62_vm4, %v240_v3, %v238_v55  ;;  %318 = vmatpush1.msra.mxu1 %v277_v63 }
 0x1f2   :  { %v273_v14 = vmul.f32 %v242_v11, %v753_v42  ;;  %v274_v15 = vmul.f32 %v241_v8, %v758_v43  ;;  %319 = vmatprep.subr.mxu1 %v276_v7 }
 0x1f3   :  { %320 = vmatpush1.msra.mxu1 %v275_v12 }
 0x1f4   :  { %v234_v16 = vpop.permute.xlu1 %233  ;;  %321 = vmatprep.subr.mxu1 %v274_v15  ;;  %v220_v2 = vpop.permute.xlu0 %219 }
 0x1f5   :  { %v235_v18 = vsel %vm55_vm5, %v232_v1, %v234_v16  ;;  %v236_v19 = vsel %vm55_vm5, %v234_v16, %v232_v1  ;;  %322 = vmatpush1.msra.mxu1 %v273_v14 }
 0x1f6   :  { %v271_v23 = vmul.f32 %v236_v19, %v772_v51  ;;  %v272_v24 = vmul.f32 %v235_v18, %v777_v52 }
 0x1f8   :  { %v228_v25 = vpop.permute.xlu1 %227  ;;  %323 = vmatprep.subr.mxu1 %v272_v24 }
 0x1f9   :  { %v229_v26 = vsel %vm48_vm6, %v226_v20, %v228_v25  ;;  %v230_v27 = vsel %vm48_vm6, %v228_v25, %v226_v20  ;;  %324 = vmatpush1.msra.mxu1 %v271_v23 }
 0x1fa   :  { %v269_v28 = vmul.f32 %v230_v27, %v789_v59  ;;  %v270_v29 = vmul.f32 %v229_v26, %v794_v60 }
 0x1fc   :  { %v222_v30 = vpop.permute.xlu1 %221  ;;  %325 = vmatprep.subr.mxu1 %v270_v29 }
 0x1fd   :  { %v223_v34 = vsel %vm41_vm7, %v220_v2, %v222_v30  ;;  %v224_v35 = vsel %vm41_vm7, %v222_v30, %v220_v2  ;;  %326 = vmatpush1.msra.mxu1 %v269_v28 }
 0x1fe   :  { %v267_v37 = vmul.f32 %v224_v35, %v806_v4  ;;  %v268_v38 = vmul.f32 %v223_v34, %v811_v5 }
 0x200   :  { %327 = vmatprep.subr.mxu1 %v268_v38 }
 0x201   :  { %328 = vmatpush1.msra.mxu1 %v267_v37  ;;  %v292_v40 = vpop.permute.xlu0 %291 }
 0x202   :  { %543 = vmatmul.mubr.msk.f32.vlgmr.msra.gmra.mxu1 %vm136_vm8, %v541_v39 }
 0x2c2   :  { %v363_v41 = vpop.f32.mrf.mxu1 }
 0x2c3   :  { %v364_v45 = vadd.f32 %v363_v41, %v292_v40 }
 0x2c4   :  { %v365_v46 = vpop.f32.mrf.mxu1 }
 0x2c5   :  { %vm369_vm11 = vcmp.ge.f32.partialorder %v364_v45, 0.0  ;;  %v372_v47 = vmul.f32 %v371_v44, %v364_v45  ;;  %v366_v48 = vadd.f32 %v365_v46, %v292_v40 }
 0x2c7   :  { %v374_v49 = vsel %vm369_vm11, %v364_v45, %v372_v47  ;;  %vm370_vm12 = vcmp.ge.f32.partialorder %v366_v48, 0.0  ;;  %v373_v50 = vmul.f32 %v371_v44, %v366_v48 }
 0x2c8   :  { %418 = vrot.lane.b32.xlu1 %v374_v49, %s578_s4  ;;  %v432_v26 = vmul.f32 %v374_v49, %v739_v36 }
 0x2c9   :  { %v375_v53 = vsel %vm370_vm12, %v366_v48, %v373_v50 }
 0x2ca   :  { %420 = vrot.lane.b32.xlu0 %v375_v53, %s578_s4 }
 0x2cc   :  { %412 = vrot.lane.b32.xlu1 %v374_v49, %s577_s25 }
 0x2ce   :  { %414 = vrot.lane.b32.xlu0 %v375_v53, %s577_s25 }
 0x2d0   :  { %406 = vrot.lane.b32.xlu1 %v374_v49, %s579_s28 }
 0x2d2   :  { %408 = vrot.lane.b32.xlu0 %v375_v53, %s579_s28 }
 0x2d4   :  { %400 = vrot.lane.b32.xlu1 %v374_v49, %s580_s29 }
 0x2d6   :  { %402 = vrot.lane.b32.xlu0 %v375_v53, %s580_s29  ;;  %s548_s29 = sld [smem:[#allocation2 + $0x100]] }
 0x2d8   :  { %394 = vrot.lane.b32.xlu1 %v374_v49, %s581_s0 }
 0x2da   :  { %396 = vrot.lane.b32.xlu0 %v375_v53, %s581_s0 }
 0x2dc   :  { %388 = vrot.lane.b32.xlu1 %v374_v49, %s583_s30  ;;  %v528_v45 = vstv %s548_s29 }
 0x2de   :  { %390 = vrot.lane.b32.xlu0 %v375_v53, %s583_s30 }
 0x2e0   :  { %382 = vrot.lane.b32.xlu1 %v374_v49, %s585_s6 }
 0x2e2   :  { %384 = vrot.lane.b32.xlu0 %v375_v53, %s585_s6 }
 0x2e4   :  { %376 = vrot.lane.b32.xlu1 %v374_v49, %s586_s7 }
 0x2e6   :  { %378 = vrot.lane.b32.xlu0 %v375_v53, %s586_s7 }
 0x2e8   :  { %448 = vperm.xlu1 %561, %v546_v54  }
 0x33a   :  { %v419_v55 = vpop.permute.xlu1 %418 }
 0x33c   :  { %v421_v56 = vpop.permute.xlu0 %420 }
 0x33d   :  { %v422_v57 = vsel %vm90_vm1, %v419_v55, %v421_v56  ;;  %v423_v58 = vsel %vm90_vm1, %v421_v56, %v419_v55 }
 0x33e   :  { %v440_v61 = vmul.f32 %v422_v57, %v679_v10  ;;  %v441_v62 = vmul.f32 %v423_v58, %v674_v9  ;;  %v413_v63 = vpop.permute.xlu1 %412 }
 0x340   :  { %v415_v0 = vpop.permute.xlu0 %414  ;;  %468 = vmatprep.subr.mxu0 %v441_v62 }
 0x341   :  { %v416_v1 = vsel %vm83_vm0, %v413_v63, %v415_v0  ;;  %v417_v3 = vsel %vm83_vm0, %v415_v0, %v413_v63  ;;  %469 = vmatpush1.msra.mxu0 %v440_v61 }
 0x342   :  { %v438_v7 = vmul.f32 %v416_v1, %v695_v17  ;;  %v439_v8 = vmul.f32 %v417_v3, %v684_v13  ;;  %v407_v11 = vpop.permute.xlu1 %406 }
 0x344   :  { %v409_v12 = vpop.permute.xlu0 %408  ;;  %470 = vmatprep.subr.mxu0 %v439_v8 }
 0x345   :  { %v410_v9 = vsel %vm76_vm2, %v407_v11, %v409_v12  ;;  %v411_v10 = vsel %vm76_vm2, %v409_v12, %v407_v11  ;;  %471 = vmatpush1.msra.mxu0 %v438_v7 }
 0x346   :  { %v436_v14 = vmul.f32 %v410_v9, %v705_v21  ;;  %v437_v15 = vmul.f32 %v411_v10, %v710_v22  ;;  %v401_v16 = vpop.permute.xlu1 %400  ;;  %v433_v21 = vmul.f32 %v375_v53, %v734_v33 }
 0x348   :  { %v403_v18 = vpop.permute.xlu0 %402  ;;  %472 = vmatprep.subr.mxu0 %v437_v15 }
 0x349   :  { %v404_v13 = vsel %vm69_vm3, %v401_v16, %v403_v18  ;;  %v405_v17 = vsel %vm69_vm3, %v403_v18, %v401_v16  ;;  %473 = vmatpush1.msra.mxu0 %v436_v14 }
 0x34a   :  { %v434_v19 = vmul.f32 %v404_v13, %v724_v31  ;;  %v435_v20 = vmul.f32 %v405_v17, %v729_v32  ;;  %v395_v23 = vpop.permute.xlu1 %394 }
 0x34c   :  { %v397_v24 = vpop.permute.xlu0 %396  ;;  %474 = vmatprep.subr.mxu0 %v435_v20 }
 0x34d   :  { %v398_v22 = vsel %vm62_vm4, %v395_v23, %v397_v24  ;;  %v399_v25 = vsel %vm62_vm4, %v397_v24, %v395_v23  ;;  %475 = vmatpush1.msra.mxu0 %v434_v19 }
 0x34e   :  { %v430_v27 = vmul.f32 %v399_v25, %v753_v42  ;;  %v431_v31 = vmul.f32 %v398_v22, %v758_v43  ;;  %476 = vmatprep.subr.mxu0 %v433_v21  ;;  %v389_v32 = vpop.permute.xlu1 %388 }
 0x34f   :  { %477 = vmatpush1.msra.mxu0 %v432_v26 }
 0x350   :  { %v391_v28 = vpop.permute.xlu0 %390  ;;  %478 = vmatprep.subr.mxu0 %v431_v31 }
 0x351   :  { %v392_v33 = vsel %vm55_vm5, %v389_v32, %v391_v28  ;;  %v393_v29 = vsel %vm55_vm5, %v391_v28, %v389_v32  ;;  %479 = vmatpush1.msra.mxu0 %v430_v27 }
 0x352   :  { %v428_v2 = vmul.f32 %v393_v29, %v772_v51  ;;  %v429_v36 = vmul.f32 %v392_v33, %v777_v52  ;;  %v383_v30 = vpop.permute.xlu1 %382 }
 0x354   :  { %v385_v42 = vpop.permute.xlu0 %384  ;;  %480 = vmatprep.subr.mxu0 %v429_v36 }
 0x355   :  { %v386_v43 = vsel %vm48_vm6, %v383_v30, %v385_v42  ;;  %v387_v34 = vsel %vm48_vm6, %v385_v42, %v383_v30  ;;  %481 = vmatpush1.msra.mxu0 %v428_v2 }
 0x356   :  { %v426_v35 = vmul.f32 %v387_v34, %v789_v59  ;;  %v427_v37 = vmul.f32 %v386_v43, %v794_v60  ;;  %v377_v38 = vpop.permute.xlu1 %376  ;;  %v545_v59 = vld [vmem:[%s977_s1 + $0x10] sm:$0xff] }
 0x358   :  { %v379_v39 = vpop.permute.xlu0 %378  ;;  %482 = vmatprep.subr.mxu0 %v427_v37 }
 0x359   :  { %v380_v51 = vsel %vm41_vm7, %v377_v38, %v379_v39  ;;  %v381_v52 = vsel %vm41_vm7, %v379_v39, %v377_v38  ;;  %483 = vmatpush1.msra.mxu0 %v426_v35 }
 0x35a   :  { %v424_v40 = vmul.f32 %v381_v52, %v806_v4  ;;  %v425_v41 = vmul.f32 %v380_v51, %v811_v5 }
 0x35c   :  { %484 = vmatprep.subr.mxu0 %v425_v41 }
 0x35d   :  { %485 = vmatpush1.msra.mxu0 %v424_v40 }
 0x35e   :  { %547 = vmatmul.mubr.msk.f32.vlgmr.msra.gmra.mxu0 %vm136_vm8, %v545_v59 }
 0x363   :  { %v449_v60 = vpop.permute.xlu1 %448 }
 0x41e   :  { %v520_v44 = vpop.f32.mrf.mxu0 }
 0x41f   :  { %v521_v46 = vadd.f32 %v520_v44, %v449_v60 }
 0x420   :  { %v522_v6 = vpop.f32.mrf.mxu0 }
 0x421   :  { %vm526_vm13 = vcmp.ge.f32.partialorder %v521_v46, 0.0  ;;  %v529_v47 = vmul.f32 %v528_v45, %v521_v46  ;;  %v523_v48 = vadd.f32 %v522_v6, %v449_v60 }
 0x423   :  { %v531_v4 = vsel %vm526_vm13, %v521_v46, %v529_v47  ;;  %vm527_vm14 = vcmp.ge.f32.partialorder %v523_v48, 0.0  ;;  %v530_v5 = vmul.f32 %v528_v45, %v523_v48 }
 0x424   :  { %533 = vst [vmem:[%s981_s5] sm:$0xff] %v531_v4 }
 0x425   :  { %v532_v49 = vsel %vm527_vm14, %v523_v48, %v530_v5 }
 0x426   :  { %534 = vst [vmem:[%s981_s5 + $0x8] sm:$0xff] %v532_v49 }
 0x427   :  { %539 = vsyncpa [#allocation3], 1 }

</bundles_post_ra>
